<compile_context>
chip_gen: v5e
topology: v5e:2x2
jax: 0.10.0
libtpu: 0.0.40
codegen_flags: <defaults>
</compile_context>

<pallas_src>
import jax
import jax.numpy as jnp
from jax import lax
from jax.experimental import pallas as pl
from jax.experimental.pallas import tpu as pltpu

EPS = 1e-5  # nn.LayerNorm default


def _round_up(x, m):
    return (x + m - 1) // m * m


def _sublane_pack(dtype):
    # Rows per packed sublane tile: f32 -> 8, bf16/f16 -> 16, int8/fp8 -> 32.
    return max(8, 32 // max(1, jnp.dtype(dtype).itemsize))


def _vmem_capacity_bytes():
    # Generation-aware VMEM size (128 MiB on v5e/v6e, 64 MiB per TC on v7x).
    try:
        return int(pltpu.get_tpu_info().vmem_capacity_bytes)
    except Exception:
        return 64 * 1024 * 1024  # conservative fallback (v7x-sized)


def _pick_tm(rows, pack, tm_max=512):
    """Row-tile size: dtype-sublane aligned, padding waste vs step overhead."""
    rows_aligned = _round_up(rows, pack)
    if rows_aligned <= tm_max:
        return rows_aligned  # single row tile, no padding beyond the pack
    best, best_cost = pack, None
    for cand in (64, 128, 256, 512):
        if cand % pack or cand > tm_max:
            continue
        # Simple model: padded rows * (1 + per-step overhead ~ 16 rows / tm).
        cost = _round_up(rows, cand) * (1.0 + 16.0 / cand)
        if best_cost is None or cost <= best_cost:
            best, best_cost = cand, cost
    return best


def _layernorm_scale_shift(x_ref, gamma_ref, beta_ref, mat_dtype):
    """Fused LayerNorm: one-pass stats, single scale/shift pass over the tile."""
    x = x_ref[...].astype(jnp.float32)            # (tm, D)
    d_inv = 1.0 / x.shape[-1]
    mean = jnp.sum(x, axis=-1, keepdims=True) * d_inv
    var = jnp.maximum(
        jnp.sum(x * x, axis=-1, keepdims=True) * d_inv - mean * mean, 0.0)
    rstd = lax.rsqrt(var + EPS)                   # EUP slot (effectively free)
    gamma = gamma_ref[...].astype(jnp.float32)    # (1, D)
    beta = beta_ref[...].astype(jnp.float32)      # (1, D)
    scale = rstd * gamma                          # (tm, D)
    shift = beta - mean * scale                   # (tm, D)
    return (x * scale + shift).astype(mat_dtype)


def _prenorm_linear_resident_kernel(x_ref, gamma_ref, beta_ref, w_ref,
                                    bias_ref, o_ref):
    # grid = (row tiles,); W (D, Hp) has a constant block index -> DMA'd once
    # and resident in VMEM.  LayerNorm runs exactly once per row tile.
    w = w_ref[...]
    y = _layernorm_scale_shift(x_ref, gamma_ref, beta_ref, w.dtype)
    out = jnp.dot(y, w, preferred_element_type=jnp.float32)
    out = out + bias_ref[...].astype(jnp.float32)
    o_ref[...] = out.astype(o_ref.dtype)


def _prenorm_linear_tiled_kernel(x_ref, gamma_ref, beta_ref, w_ref,
                                 bias_ref, o_ref, y_ref):
    # grid = (row tiles, hidden tiles); the hidden axis is "arbitrary", so the
    # normalized row tile cached in y_ref at j == 0 is valid for all j > 0.
    @pl.when(pl.program_id(1) == 0)
    def _():
        y_ref[...] = _layernorm_scale_shift(x_ref, gamma_ref, beta_ref,
                                            y_ref.dtype)

    out = jnp.dot(y_ref[...], w_ref[...], preferred_element_type=jnp.float32)
    out = out + bias_ref[...].astype(jnp.float32)
    o_ref[...] = out.astype(o_ref.dtype)


def prenorm_linear(x, gamma, beta, w, bias, *, out_dtype=None, tm=None,
                   tn=None, _force_path=None):
    """PreNorm(dim, Linear(dim, H)) forward: Linear(LayerNorm(x)).

    x: (B, N, D); gamma/beta: (D,); w: (D, H); bias: (H,) -> (B, N, H).
    The matmul runs in w's stored dtype (bf16 weights stay bf16 on the MXU);
    LayerNorm statistics and the matmul accumulation are kept in float32.
    """
    B, N, D = x.shape
    H = w.shape[1]
    rows = B * N
    out_dtype = jnp.dtype(x.dtype if out_dtype is None else out_dtype)
    x_b = jnp.dtype(x.dtype).itemsize
    w_b = jnp.dtype(w.dtype).itemsize
    o_b = out_dtype.itemsize

    vmem_cap = _vmem_capacity_bytes()
    vmem_budget = (vmem_cap * 3) // 4        # leave headroom for the compiler

    # --- Row tiling: dtype-aware sublane pack, bounded padding waste. ---
    pack = _sublane_pack(x.dtype)
    tm0 = _pick_tm(rows, pack) if tm is None else max(pack, _round_up(tm, pack))

    Hp128 = _round_up(H, 128)                # lane-dense output columns
    param_bytes = (4 * D * jnp.dtype(gamma.dtype).itemsize
                   + 2 * Hp128 * jnp.dtype(bias.dtype).itemsize)

    # --- Path selection: keep the whole weight resident in VMEM when it fits.
    # (W's block index is constant so the pipeline fetches it from HBM once;
    #  the feasibility check still budgets 2 buffers since BlockSpec inputs
    #  are double-buffered.)
    def resident_need(tm_):
        return (2 * tm_ * D * x_b            # x tiles (double-buffered)
                + 2 * D * Hp128 * w_b        # resident weight
                + 2 * tm_ * Hp128 * o_b      # out tiles (double-buffered)
                + param_bytes)

    tm_res = None
    for cand in sorted({tm0, 256, 128}, reverse=True):
        cand = max(pack, _round_up(min(cand, tm0), pack))
        if resident_need(cand) <= vmem_budget:
            tm_res = cand
            break
    use_resident = (tm_res is not None) and (_force_path != "tiled")

    if use_resident:
        tm_sel = tm_res
        tn_sel = Hp128
        Hp = Hp128
        vmem_need = resident_need(tm_sel)
    else:
        tm_sel = tm0
        tn_sel = 512 if tn is None else tn
        tn_sel = max(128, _round_up(min(tn_sel, Hp128), 128))

        def tiled_need(tm_, tn_):
            return (2 * tm_ * D * x_b + 2 * D * tn_ * w_b
                    + 2 * tm_ * tn_ * o_b
                    + tm_ * D * w_b          # cached normalized activations
                    + param_bytes)

        while tiled_need(tm_sel, tn_sel) > vmem_budget and tn_sel > 128:
            tn_sel = max(128, (tn_sel // 2) // 128 * 128)
        while tiled_need(tm_sel, tn_sel) > vmem_budget and tm_sel > pack:
            tm_sel = max(pack, _round_up(tm_sel // 2, pack))
        # Pad H up to a multiple of tn (never shrink tn to force divisibility).
        Hp = _round_up(Hp128, tn_sel)
        vmem_need = tiled_need(tm_sel, tn_sel)

    rows_p = _round_up(rows, tm_sel)
    n_i = rows_p // tm_sel
    n_j = Hp // tn_sel

    # --- Pad inputs (padded rows / columns are sliced off after the call). ---
    x2 = x.reshape(rows, D)
    if rows_p != rows:
        x2 = jnp.pad(x2, ((0, rows_p - rows), (0, 0)))
    wp = w if Hp == H else jnp.pad(w, ((0, 0), (0, Hp - H)))
    biasp = bias if Hp == H else jnp.pad(bias, (0, Hp - H))
    gamma2 = gamma.reshape(1, D)
    beta2 = beta.reshape(1, D)
    bias2 = biasp.reshape(1, Hp)

    vmem_limit = int(min(max(2 * vmem_need, 32 * 1024 * 1024), vmem_budget))

    w_reads = 1 if use_resident else n_i     # W traffic from HBM
    cost = pl.CostEstimate(
        flops=2 * rows_p * D * Hp + 8 * rows_p * D,
        transcendentals=rows_p,
        bytes_accessed=(rows_p * D * x_b + w_reads * D * Hp * w_b
                        + rows_p * Hp * o_b),
    )

    if use_resident:
        grid = (n_i,)
        in_specs = [
            pl.BlockSpec((tm_sel, D), lambda i: (i, 0)),     # x row tile
            pl.BlockSpec((1, D), lambda i: (0, 0)),          # gamma
            pl.BlockSpec((1, D), lambda i: (0, 0)),          # beta
            pl.BlockSpec((D, Hp), lambda i: (0, 0)),         # W (resident)
            pl.BlockSpec((1, Hp), lambda i: (0, 0)),         # bias
        ]
        out_specs = pl.BlockSpec((tm_sel, Hp), lambda i: (i, 0))
        scratch_shapes = []
        kernel = _prenorm_linear_resident_kernel
        dim_sem = ("parallel",)
    else:
        grid = (n_i, n_j)
        in_specs = [
            pl.BlockSpec((tm_sel, D), lambda i, j: (i, 0)),   # x row tile
            pl.BlockSpec((1, D), lambda i, j: (0, 0)),        # gamma
            pl.BlockSpec((1, D), lambda i, j: (0, 0)),        # beta
            pl.BlockSpec((D, tn_sel), lambda i, j: (0, j)),   # W column tile
            pl.BlockSpec((1, tn_sel), lambda i, j: (0, j)),   # bias tile
        ]
        out_specs = pl.BlockSpec((tm_sel, tn_sel), lambda i, j: (i, j))
        # Normalized-row cache (matmul dtype), written at j == 0, reused j > 0.
        scratch_shapes = [pltpu.VMEM((tm_sel, D), wp.dtype)]
        kernel = _prenorm_linear_tiled_kernel
        # Rows "parallel" (the v7x 2-TC split stays on rows so the j==0 LN
        # cache is valid per core); hidden axis sequential ("arbitrary").
        dim_sem = ("parallel", "arbitrary")

    out2 = pl.pallas_call(
        kernel,
        out_shape=jax.ShapeDtypeStruct((rows_p, Hp), out_dtype),
        grid_spec=pltpu.PrefetchScalarGridSpec(
            num_scalar_prefetch=0,
            grid=grid,
            in_specs=in_specs,
            out_specs=out_specs,
            scratch_shapes=scratch_shapes,
        ),
        compiler_params=pltpu.CompilerParams(
            dimension_semantics=dim_sem,
            vmem_limit_bytes=vmem_limit),
        cost_estimate=cost,
    )(x2, gamma2, beta2, wp, bias2)

    return out2[:rows, :H].reshape(B, N, H)


def prenorm_linear_ref(x, gamma, beta, w, bias):
    """Pure-JAX reference matching torch: fn(LayerNorm(x))."""
    xf = x.astype(jnp.float32)
    mean = jnp.mean(xf, axis=-1, keepdims=True)
    var = jnp.mean((xf - mean) ** 2, axis=-1, keepdims=True)
    y = (xf - mean) / jnp.sqrt(var + EPS) * gamma.astype(jnp.float32) \
        + beta.astype(jnp.float32)
    out = y @ w.astype(jnp.float32) + bias.astype(jnp.float32)
    return out.astype(x.dtype)


if __name__ == "__main__":
    key = jax.random.PRNGKey(0)

    def make_case(case_id, B, N, D, H, dtype):
        k1, k2, k3, k4, k5 = jax.random.split(jax.random.fold_in(key, case_id), 5)
        x = jax.random.normal(k1, (B, N, D), dtype=jnp.float32).astype(dtype)
        gamma = (1.0 + 0.1 * jax.random.normal(k2, (D,), jnp.float32)).astype(dtype)
        beta = (0.05 * jax.random.normal(k3, (D,), jnp.float32)).astype(dtype)
        w = (0.02 * jax.random.normal(k4, (D, H), jnp.float32)).astype(dtype)
        bias = (0.01 * jax.random.normal(k5, (H,), jnp.float32)).astype(dtype)
        return x, gamma, beta, w, bias

    # Case 1: toy ViT-ish shape; small W -> resident-W single-axis grid.
    x, g, b, w, bi = make_case(1, 2, 8, 32, 32, jnp.float32)
    out = jax.block_until_ready(prenorm_linear(x, g, b, w, bi))
    ref = prenorm_linear_ref(x, g, b, w, bi)
    assert out.shape == (2, 8, 32), out.shape
    assert jnp.allclose(out, ref, atol=1e-4, rtol=1e-4), float(
        jnp.max(jnp.abs(out - ref)))

    # Case 2: exercises H padding (160 -> 256) and a non-trivial row tile.
    x, g, b, w, bi = make_case(2, 2, 200, 64, 160, jnp.float32)
    out = jax.block_until_ready(prenorm_linear(x, g, b, w, bi))
    ref = prenorm_linear_ref(x, g, b, w, bi)
    assert out.shape == (2, 200, 160), out.shape
    assert jnp.allclose(out, ref, atol=2e-3, rtol=2e-3), float(
        jnp.max(jnp.abs(out - ref)))

    # Case 3: bf16 path (MXU-native matmul dtype, f32 stats/accumulation).
    x, g, b, w, bi = make_case(3, 2, 16, 128, 256, jnp.bfloat16)
    out = jax.block_until_ready(prenorm_linear(x, g, b, w, bi))
    ref = prenorm_linear_ref(x, g, b, w, bi)
    assert out.shape == (2, 16, 256), out.shape
    assert jnp.allclose(out.astype(jnp.float32), ref.astype(jnp.float32),
                        atol=1e-1, rtol=1e-1)
    assert bool(jnp.all(jnp.isfinite(out.astype(jnp.float32))))

    # Case 4: force the tiled (rows x hidden) path with a multi-step hidden
    # axis to exercise the j==0 LayerNorm cache + "arbitrary" semantics.
    x, g, b, w, bi = make_case(4, 2, 40, 64, 384, jnp.float32)
    out = jax.block_until_ready(
        prenorm_linear(x, g, b, w, bi, tn=128, _force_path="tiled"))
    ref = prenorm_linear_ref(x, g, b, w, bi)
    assert out.shape == (2, 40, 384), out.shape
    assert jnp.allclose(out, ref, atol=2e-3, rtol=2e-3), float(
        jnp.max(jnp.abs(out - ref)))

    print("KERNEL_OK")
</pallas_src>

<mosaic_0001>
module attributes {stable_mosaic.version = 11 : i64} {
  func.func @_prenorm_linear_resident_kernel(%arg0: i32, %arg1: memref<16x32xf32, #tpu.memory_space<vmem>>, %arg2: memref<1x32xf32, #tpu.memory_space<vmem>>, %arg3: memref<1x32xf32, #tpu.memory_space<vmem>>, %arg4: memref<32x128xf32, #tpu.memory_space<vmem>>, %arg5: memref<1x128xf32, #tpu.memory_space<vmem>>, %arg6: memref<16x128xf32, #tpu.memory_space<vmem>>) attributes {dimension_semantics = [#tpu.dimension_semantics<parallel>], iteration_bounds = array<i64: 1>, scalar_prefetch = 0 : i64, scratch_operands = 0 : i64, tpu.core_type = #tpu.core_type<tc>, window_params = [{transform_indices = @transform_0, window_bounds = array<i64: 16, 32>}, {pipeline_mode = #tpu.pipeline_mode<synchronous>, transform_indices = @transform_1, window_bounds = array<i64: 1, 32>}, {pipeline_mode = #tpu.pipeline_mode<synchronous>, transform_indices = @transform_2, window_bounds = array<i64: 1, 32>}, {pipeline_mode = #tpu.pipeline_mode<synchronous>, transform_indices = @transform_3, window_bounds = array<i64: 32, 128>}, {pipeline_mode = #tpu.pipeline_mode<synchronous>, transform_indices = @transform_4, window_bounds = array<i64: 1, 128>}, {transform_indices = @transform_5, window_bounds = array<i64: 16, 128>}]} {
    %c0 = arith.constant 0 : index
    %c0_0 = arith.constant 0 : index
    %0 = vector.load %arg4[%c0, %c0_0] : memref<32x128xf32, #tpu.memory_space<vmem>>, vector<32x128xf32>
    %c0_1 = arith.constant 0 : index
    %c0_2 = arith.constant 0 : index
    %1 = vector.load %arg1[%c0_1, %c0_2] : memref<16x32xf32, #tpu.memory_space<vmem>>, vector<16x32xf32>
    %cst = arith.constant dense<0.000000e+00> : vector<16xf32>
    %2 = vector.multi_reduction <add>, %1, %cst [1] : vector<16x32xf32> to vector<16xf32>
    %3 = vector.shape_cast %2 : vector<16xf32> to vector<16x1xf32>
    %cst_3 = arith.constant 3.125000e-02 : f32
    %4 = vector.broadcast %cst_3 : f32 to vector<16x1xf32>
    %5 = arith.mulf %3, %4 : vector<16x1xf32>
    %6 = arith.mulf %1, %1 : vector<16x32xf32>
    %cst_4 = arith.constant dense<0.000000e+00> : vector<16xf32>
    %7 = vector.multi_reduction <add>, %6, %cst_4 [1] : vector<16x32xf32> to vector<16xf32>
    %8 = vector.shape_cast %7 : vector<16xf32> to vector<16x1xf32>
    %cst_5 = arith.constant 3.125000e-02 : f32
    %9 = vector.broadcast %cst_5 : f32 to vector<16x1xf32>
    %10 = arith.mulf %8, %9 : vector<16x1xf32>
    %11 = arith.mulf %5, %5 : vector<16x1xf32>
    %12 = arith.subf %10, %11 : vector<16x1xf32>
    %cst_6 = arith.constant 0.000000e+00 : f32
    %13 = vector.broadcast %cst_6 : f32 to vector<16x1xf32>
    %14 = arith.maximumf %12, %13 : vector<16x1xf32>
    %cst_7 = arith.constant 9.99999974E-6 : f32
    %15 = vector.broadcast %cst_7 : f32 to vector<16x1xf32>
    %16 = arith.addf %14, %15 : vector<16x1xf32>
    %17 = math.rsqrt %16 : vector<16x1xf32>
    %c0_8 = arith.constant 0 : index
    %c0_9 = arith.constant 0 : index
    %18 = vector.load %arg2[%c0_8, %c0_9] : memref<1x32xf32, #tpu.memory_space<vmem>>, vector<1x32xf32>
    %c0_10 = arith.constant 0 : index
    %c0_11 = arith.constant 0 : index
    %19 = vector.load %arg3[%c0_10, %c0_11] : memref<1x32xf32, #tpu.memory_space<vmem>>, vector<1x32xf32>
    %20 = vector.broadcast %17 : vector<16x1xf32> to vector<16x32xf32>
    %21 = vector.broadcast %18 : vector<1x32xf32> to vector<16x32xf32>
    %22 = arith.mulf %20, %21 : vector<16x32xf32>
    %23 = vector.broadcast %5 : vector<16x1xf32> to vector<16x32xf32>
    %24 = arith.mulf %23, %22 : vector<16x32xf32>
    %25 = vector.broadcast %19 : vector<1x32xf32> to vector<16x32xf32>
    %26 = arith.subf %25, %24 : vector<16x32xf32>
    %27 = arith.mulf %1, %22 : vector<16x32xf32>
    %28 = arith.addf %27, %26 : vector<16x32xf32>
    %cst_12 = arith.constant dense<0.000000e+00> : vector<16x128xf32>
    %29 = tpu.matmul %28, %0, %cst_12 {dimension_numbers = #tpu.dot_dimension_numbers<[1], [0], [0], [1], [0, 0, 1, 1], [], []>} : vector<16x32xf32>, vector<32x128xf32>, vector<16x128xf32> -> vector<16x128xf32>
    %c0_13 = arith.constant 0 : index
    %c0_14 = arith.constant 0 : index
    %30 = vector.load %arg5[%c0_13, %c0_14] : memref<1x128xf32, #tpu.memory_space<vmem>>, vector<1x128xf32>
    %31 = vector.broadcast %30 : vector<1x128xf32> to vector<16x128xf32>
    %32 = arith.addf %29, %31 : vector<16x128xf32>
    %c0_15 = arith.constant 0 : index
    %c0_16 = arith.constant 0 : index
    %33 = vector.load %arg6[%c0_15, %c0_16] : memref<16x128xf32, #tpu.memory_space<vmem>>, vector<16x128xf32>
    tpu.vector_store %arg6[%c0_15, %c0_16], %32 {strides = array<i32>} : memref<16x128xf32, #tpu.memory_space<vmem>>, vector<16x128xf32>,
    return
  }
  func.func @transform_0(%arg0: i32) -> (i32, i32) {
    %c0_i32 = arith.constant 0 : i32
    %c0_i32_0 = arith.constant 0 : i32
    return %arg0, %c0_i32 : i32, i32
  }
  func.func @transform_1(%arg0: i32) -> (i32, i32) {
    %c0_i32 = arith.constant 0 : i32
    %c0_i32_0 = arith.constant 0 : i32
    %c0_i32_1 = arith.constant 0 : i32
    return %c0_i32, %c0_i32_0 : i32, i32
  }
  func.func @transform_2(%arg0: i32) -> (i32, i32) {
    %c0_i32 = arith.constant 0 : i32
    %c0_i32_0 = arith.constant 0 : i32
    %c0_i32_1 = arith.constant 0 : i32
    return %c0_i32, %c0_i32_0 : i32, i32
  }
  func.func @transform_3(%arg0: i32) -> (i32, i32) {
    %c0_i32 = arith.constant 0 : i32
    %c0_i32_0 = arith.constant 0 : i32
    %c0_i32_1 = arith.constant 0 : i32
    return %c0_i32, %c0_i32_0 : i32, i32
  }
  func.func @transform_4(%arg0: i32) -> (i32, i32) {
    %c0_i32 = arith.constant 0 : i32
    %c0_i32_0 = arith.constant 0 : i32
    %c0_i32_1 = arith.constant 0 : i32
    return %c0_i32, %c0_i32_0 : i32, i32
  }
  func.func @transform_5(%arg0: i32) -> (i32, i32) {
    %c0_i32 = arith.constant 0 : i32
    %c0_i32_0 = arith.constant 0 : i32
    return %arg0, %c0_i32 : i32, i32
  }
}

</mosaic_0001>

<bundles_post_ra>
// kernel: tpu_custom_call.1
= control target key start
LH: loop header
LB: loop body
LE: loop exit
PB: predicated region body
PF: predicated region fallthrough
CT: control target
= control target key end

     0   :  { %10 = vsyncpa [#allocation3], 0  ;;  %s394_s0 = inlined_call_operand.hbm [shape: f32[16,32], index: 0, kind: input, shape index: {}]   ;;  %s395_s1 = inlined_call_operand.hbm [shape: f32[1,32], index: 1, kind: input, shape index: {}]   ;;  %s396_s2 = inlined_call_operand.vmem [shape: f32[1,32], index: 2, kind: input, shape index: {}]   ;;  %s397_s3 = inlined_call_operand.hbm [shape: f32[32,128], index: 3, kind: input, shape index: {}]   ;;  %s398_s4 = inlined_call_operand.vmem [shape: f32[1,128], index: 4, kind: input, shape index: {}]   ;;  %s399_s5 = inlined_call_operand.hbm [shape: f32[16,128], index: 5, kind: output, shape index: {}]  }
   0x1   :  { %11 = vsyncpa [#allocation6], 0  ;;  %s31_s20 = sshll.u32 %s395_s1, 4  ;;  %s32_s20 = int_to_ptr.hbm [resolvable:$true] %s31_s20 }
   0x2   :  { %12 = vsyncpa [#allocation4], 0  ;;  %s313_s21 = smov [#allocation5]   ;;  %s17_s25 = sshll.u32 %s394_s0, 4  ;;  %s18_s25 = int_to_ptr.hbm [resolvable:$true] %s17_s25 }
   0x3   :  { %s33_s22 = sshll.u32 %s313_s21, 4  ;;  %s314_s26 = smov [#allocation2]   ;;  %s34_s22 = int_to_ptr.vmem [resolvable:$true] %s33_s22 }
   0x4   :  { %36 = dma.hbm_to_vmem [thread:$0]  %s32_s20, 16, %s34_s22, [#allocation6]  }
   0x5   :  { %s19_s27 = sshll.u32 %s314_s26, 4  ;;  %s315_s28 = smov 128   ;;  %s20_s27 = int_to_ptr.vmem [resolvable:$true] %s19_s27 }
   0x6   :  { %s316_s29 = smov 8   ;;  %s43_s6 = sshll.u32 %s397_s3, 4  ;;  %s44_s6 = int_to_ptr.hbm [resolvable:$true] %s43_s6 }
   0x7   :  { %25 = dma.hbm_to_vmem [thread:$0]  %s18_s25, 256, %s20_s27, [#allocation3], %s315_s28, %s315_s28, %s316_s29  }
   0x8   :  { %s317_s7 = smov [#allocation7]  }
   0x9   :  { %s45_s8 = sshll.u32 %s317_s7, 4  ;;  %s46_s8 = int_to_ptr.vmem [resolvable:$true] %s45_s8 }
   0xa   :  { %51 = dma.hbm_to_vmem [thread:$0]  %s44_s6, 512, %s46_s8, [#allocation6], %s315_s28, %s315_s28, %s316_s29  }
   0xb   :  { %307 = dma.done.wait [#allocation3], 256  }
   0xc   :  { %308 = vsyncadd [#allocation3], 4294967040 }
   0xd   :  { %309 = dma.done.wait [#allocation6], 528  }
   0xe   :  { %310 = vsyncadd [#allocation6], 4294966768  ;;  %vm72_vm0 = vcmask 261120   ;;  %v364_v0 = vld [vmem:[#allocation2] sm:$0xff]  ;;  %v370_v3 = vld [vmem:[#allocation2 + $0x8] sm:$0xff]  ;;  %s318_s10 = smov [#allocation8]  }
   0xf   :  { %v73_v1 = vsel %vm72_vm0, %v364_v0, 0.0  ;;  %v81_v2 = vmul.f32 %v364_v0, %v364_v0  ;;  %v82_v5 = vmul.f32 %v370_v3, %v370_v3  ;;  %v76_v6 = vsel %vm72_vm0, %v370_v3, 0.0  ;;  %v69_v8 = vld [vmem:[#allocation7 + $0x18] sm:$0xff]  ;;  %v68_v9 = vld [vmem:[#allocation7 + $0x10] sm:$0xff]  ;;  %v67_v12 = vld [vmem:[#allocation7 + $0x8] sm:$0xff]  ;;  %s176_s11 = sshll.u32 %s318_s10, 4  ;;  %s177_s11 = int_to_ptr.vmem [resolvable:$true] %s176_s11 }
  0x10   :  { %74 = vadd.xlane.f32.xlu0 %v73_v1  ;;  %159 = vmatpush.msra.mxu0 %v69_v8  ;;  %v66_v14 = vld [vmem:[#allocation7] sm:$0xff]  ;;  %v204_v34 = vld [vmem:[#allocation5] ss:$0 sm:$0xff]  ;;  %v205_v40 = vld [vmem:[%s396_s2] ss:$0 sm:$0xff]  ;;  %s178_s14 = sshll.u32 %s399_s5, 4  ;;  %s179_s14 = int_to_ptr.hbm [resolvable:$true] %s178_s14 }
  0x11   :  { %v83_v4 = vsel %vm72_vm0, %v81_v2, 0.0  ;;  %v86_v7 = vsel %vm72_vm0, %v82_v5, 0.0  ;;  %194 = vmatpush.msra.mxu1 %v69_v8  ;;  %v206_v54 = vld [vmem:[%s398_s4] ss:$0 sm:$0xff] }
  0x12   :  { %84 = vadd.xlane.f32.xlu1 %v83_v4  ;;  %160 = vmatpush.msra.mxu0 %v68_v9 }
  0x13   :  { %195 = vmatpush.msra.mxu1 %v68_v9 }
  0x14   :  { %161 = vmatpush.msra.mxu0 %v67_v12 }
  0x15   :  { %196 = vmatpush.msra.mxu1 %v67_v12 }
  0x16   :  { %162 = vmatpush.msra.mxu0 %v66_v14 }
  0x17   :  { %197 = vmatpush.msra.mxu1 %v66_v14 }
  0x18   :  { %77 = vadd.xlane.f32.xlu0 %v76_v6 }
  0x1a   :  { %87 = vadd.xlane.f32.xlu1 %v86_v7 }
  0x83   :  { %v75_v10 = vpop.xlane.xlu0 %74 }
  0x84   :  { %v79_v11 = vmul.f32 0.03125, %v75_v10 }
  0x85   :  { %v85_v13 = vpop.xlane.xlu1 %84 }
  0x86   :  { %v91_v15 = vmul.f32 %v79_v11, %v79_v11  ;;  %v89_v16 = vmul.f32 0.03125, %v85_v13 }
  0x88   :  { %v93_v17 = vsub.f32 %v89_v16, %v91_v15 }
  0x8a   :  { %v95_v18 = vmax.f32 %v93_v17, 0.0 }
  0x8b   :  { %v78_v19 = vpop.xlane.xlu0 %77 }
  0x8c   :  { %v97_v20 = vadd.f32 1e-05, %v95_v18  ;;  %v80_v21 = vmul.f32 0.03125, %v78_v19 }
  0x8d   :  { %v88_v22 = vpop.xlane.xlu1 %87 }
  0x8e   :  { %207 = vrsqrt.f32 %v97_v20  ;;  %v92_v23 = vmul.f32 %v80_v21, %v80_v21  ;;  %v90_v24 = vmul.f32 0.03125, %v88_v22  ;;  %vm105_vm2 = vweird.f32 %v97_v20 }
  0x90   :  { %v94_v25 = vsub.f32 %v90_v24, %v92_v23 }
  0x92   :  { %v96_v26 = vmax.f32 %v94_v25, 0.0 }
  0x94   :  { %v208_v27 = vpop.eup %207  ;;  %v98_v28 = vadd.f32 1e-05, %v96_v26 }
  0x95   :  { %v100_v29 = vmul.f32 %v208_v27, %v97_v20  ;;  %vm106_vm1 = vweird.f32 %v208_v27 }
  0x96   :  { %209 = vrsqrt.f32 %v98_v28  ;;  %vm107_vm3 = vmor %vm105_vm2, %vm106_vm1  ;;  %vm115_vm5 = vweird.f32 %v98_v28 }
  0x97   :  { %v101_v30 = vmul.f32 %v208_v27, %v100_v29 }
  0x99   :  { %v102_v31 = vmul.f32 0.5, %v101_v30 }
  0x9b   :  { %v103_v32 = vsub.f32 1.5, %v102_v31 }
  0x9c   :  { %v210_v33 = vpop.eup %209 }
  0x9d   :  { %v104_v35 = vmul.f32 %v208_v27, %v103_v32  ;;  %v110_v36 = vmul.f32 %v210_v33, %v98_v28  ;;  %vm116_vm4 = vweird.f32 %v210_v33 }
  0x9e   :  { %vm117_vm6 = vmor %vm115_vm5, %vm116_vm4 }
  0x9f   :  { %v111_v37 = vmul.f32 %v210_v33, %v110_v36  ;;  %v108_v38 = vsel %vm107_vm3, %v208_v27, %v104_v35 }
  0xa0   :  { %v124_v39 = vmul.f32 %v204_v34, %v108_v38 }
  0xa1   :  { %v112_v41 = vmul.f32 0.5, %v111_v37 }
  0xa2   :  { %v126_v42 = vmul.f32 %v124_v39, %v79_v11  ;;  %v133_v45 = vmul.f32 %v124_v39, %v364_v0 }
  0xa3   :  { %v113_v43 = vsub.f32 1.5, %v112_v41 }
  0xa4   :  { %v131_v44 = vsub.f32 %v205_v40, %v126_v42 }
  0xa5   :  { %v114_v46 = vmul.f32 %v210_v33, %v113_v43 }
  0xa6   :  { %v135_v47 = vadd.f32 %v133_v45, %v131_v44 }
  0xa7   :  { %v118_v48 = vsel %vm117_vm6, %v210_v33, %v114_v46 }
  0xa8   :  { %192 = vmatmul.msk.f32.vlgmr.msra.gmra.mxu0 %vm72_vm0, %v135_v47  ;;  %v125_v49 = vmul.f32 %v204_v34, %v118_v48 }
  0xaa   :  { %v127_v50 = vmul.f32 %v125_v49, %v80_v21  ;;  %v134_v52 = vmul.f32 %v125_v49, %v370_v3 }
  0xac   :  { %v132_v51 = vsub.f32 %v205_v40, %v127_v50 }
  0xae   :  { %v136_v53 = vadd.f32 %v134_v52, %v132_v51 }
  0xb0   :  { %193 = vmatmul.msk.f32.vlgmr.msra.gmra.mxu1 %vm72_vm0, %v136_v53 }
 0x125   :  { %v164_v55 = vpop.f32.mrf.mxu0 }
 0x126   :  { %v165_v56 = vadd.f32 %v206_v54, %v164_v55 }
 0x128   :  { %170 = vst [vmem:[#allocation8] sm:$0xff] %v165_v56 }
 0x12d   :  { %v167_v57 = vpop.f32.mrf.mxu1 }
 0x12e   :  { %v168_v58 = vadd.f32 %v206_v54, %v167_v57 }
 0x130   :  { %171 = vst [vmem:[#allocation8 + $0x8] sm:$0xff] %v168_v58 }
 0x131   :  { %184 = dma.vmem_to_hbm [thread:$0]  %s177_s11, 256, %s179_s14, [#allocation4], %s315_s28, %s315_s28, %s316_s29  }
 0x132   :  { %311 = dma.done.wait [#allocation4], 256  }
 0x133   :  { %312 = vsyncadd [#allocation4], 4294967040 }
 0x134   :  { %189 = vsyncpa [#allocation3], 1 }
 0x135   :  { %190 = vsyncpa [#allocation6], 1 }
 0x136   :  { %191 = vsyncpa [#allocation4], 1 }

</bundles_post_ra>
